<compile_context>
chip_gen: v6e
topology: v6e:2x2x1
jax: 0.10.0
libtpu: 0.0.40
codegen_flags: <defaults>
</compile_context>

<pallas_src>
import math

import jax
import jax.numpy as jnp
from jax import lax
from jax.experimental import pallas as pl
from jax.experimental.pallas import tpu as pltpu

LANES = 128
SUBLANES = 8
CHUNK_ROWS = 256                 # in-kernel streaming chunk: 256x128 f32 = 128 KiB
BLOCK_BYTES = 2 * 1024 * 1024    # ~2 MiB per input block per grid step

_HALF_PI = 0.5 * math.pi
# Odd Taylor coefficients of sin on [-pi/2, pi/2] (x^3 ... x^11); |err| < 6e-8.
_SIN_COEFFS = (
    -1.0 / 6.0,
    1.0 / 120.0,
    -1.0 / 5040.0,
    1.0 / 362880.0,
    -1.0 / 39916800.0,
)


def _sin_sq_half_pi(t):
    """sin(pi/2 * t)**2 for t in [-1, 1] (t = tanh(v), so always in range).

    Bounded-domain polynomial on the VALU: no range reduction / compares
    needed, unlike the generic jnp.sin lowering (sin is not EUP-native).
    """
    x = _HALF_PI * t
    u = x * x
    p = _SIN_COEFFS[-1]
    for c in _SIN_COEFFS[-2::-1]:
        p = p * u + c
    s = x * (1.0 + u * p)
    return s * s


def _partials(v):
    vf = v.astype(jnp.float32)
    t = jnp.tanh(vf)                    # EUP-native
    c = _sin_sq_half_pi(t)              # == 1 - cos(pi/2 t)^2 (the "x_cos" weight)
    # tanh is monotone with tanh(0)=0, so (t <= 0) == (v <= 0).
    cm = jnp.where(vf <= 0.0, c, 0.0)
    rows = vf.shape[0]
    # VPU-only sublane/lane-preserving fold onto an (8,128) slab; the single
    # cross-lane reduce happens once in the tiny JAX epilogue.
    c_p = jnp.sum(c.reshape(rows // SUBLANES, SUBLANES, LANES), axis=0)
    m_p = jnp.sum(cm.reshape(rows // SUBLANES, SUBLANES, LANES), axis=0)
    return c_p, m_p


def _make_kernel(chunk_rows, rows_per_block):
    n_chunks = rows_per_block // chunk_rows

    def kernel(x_ref, y_ref, o_ref):
        step = pl.program_id(0)

        @pl.when(step == 0)
        def _init():
            o_ref[...] = jnp.zeros_like(o_ref)

        def chunk_diffs(r0):
            cx, mx = _partials(x_ref[pl.ds(r0, chunk_rows), :])
            cy, my = _partials(y_ref[pl.ds(r0, chunk_rows), :])
            return cx - cy, mx - my

        if n_chunks == 1:
            dc, dm = chunk_diffs(0)
        else:
            def body(i, carry):
                acc_c, acc_m = carry
                r0 = pl.multiple_of(i * chunk_rows, chunk_rows)
                pc, pm = chunk_diffs(r0)
                return acc_c + pc, acc_m + pm

            zero = jnp.zeros((SUBLANES, LANES), jnp.float32)
            dc, dm = lax.fori_loop(0, n_chunks, body, (zero, zero), unroll=2)

        # Difference accumulation into the resident output slab (2 RMWs, not 4).
        o_ref[0] = o_ref[0] + dc    # sum(sin^2)_x - sum(sin^2)_y
        o_ref[1] = o_ref[1] + dm    # h0_x - h0_y   (h0 = sum(sin^2 * (v <= 0)))

    return kernel


def _round_up(a, b):
    return ((a + b - 1) // b) * b


def euclidean_pallas(x, y, *, batch_size, n_bin=3):
    # n_bin / min / max / sigma never influence the forward pass (the bin
    # centers are unused by SinCosHistogram.forward), so n_bin is unused.
    del n_bin

    xs = jnp.reshape(x, (-1,))
    ys = jnp.reshape(y, (-1,))
    assert xs.size == ys.size, "x and y must have the same number of elements"
    n = xs.size

    isz_x = jnp.dtype(xs.dtype).itemsize
    isz_y = jnp.dtype(ys.dtype).itemsize
    sub = max(SUBLANES, 32 // min(isz_x, isz_y))      # 8 f32, 16 bf16, 32 int8

    # ~2 MiB per input block per grid step.
    cap_rows = max(CHUNK_ROWS, BLOCK_BYTES // (LANES * max(isz_x, isz_y)))

    rows_needed = _round_up(pl.cdiv(n, LANES), sub)
    chunk_rows = min(CHUNK_ROWS, rows_needed)
    rows_per_block = min(_round_up(rows_needed, chunk_rows),
                         _round_up(cap_rows, chunk_rows))
    steps = pl.cdiv(rows_needed, rows_per_block)
    padded_rows = steps * rows_per_block
    padded_n = padded_rows * LANES

    if padded_n != n:
        # Zero pads contribute exactly 0 to both partial sums (tanh(0)=0 =>
        # sin^2=0), and the equal pad counts cancel in the h1 difference.
        xs = jnp.pad(xs, (0, padded_n - n))
        ys = jnp.pad(ys, (0, padded_n - n))
    x2d = xs.reshape(padded_rows, LANES)
    y2d = ys.reshape(padded_rows, LANES)

    cost = pl.CostEstimate(
        flops=44 * padded_n,                      # ~22 VALU ops/elem, x and y
        transcendentals=2 * padded_n,             # one tanh per element, x and y
        bytes_accessed=padded_n * (isz_x + isz_y) + 2 * SUBLANES * LANES * 4,
    )

    parts = pl.pallas_call(
        _make_kernel(chunk_rows, rows_per_block),
        out_shape=jax.ShapeDtypeStruct((2, SUBLANES, LANES), jnp.float32),
        grid_spec=pltpu.PrefetchScalarGridSpec(
            num_scalar_prefetch=0,
            grid=(steps,),
            in_specs=[
                pl.BlockSpec((rows_per_block, LANES), lambda i: (i, 0)),
                pl.BlockSpec((rows_per_block, LANES), lambda i: (i, 0)),
            ],
            # Constant output block index over the reduction axis -> the
            # output slab stays resident in VMEM across all steps.
            out_specs=pl.BlockSpec((2, SUBLANES, LANES), lambda i: (0, 0, 0)),
        ),
        compiler_params=pltpu.CompilerParams(
            dimension_semantics=("arbitrary",),
            vmem_limit_bytes=32 * 1024 * 1024,
        ),
        cost_estimate=cost,
    )(x2d, y2d)

    # Tiny XLA epilogue: one cross-lane/sublane reduce + the 3-bin distance.
    # h1 = N - sum_c and N (same for x and y, padding included) cancels;
    # h2 = sum_c - h0.
    diffs = jnp.sum(parts, axis=(1, 2))
    s = diffs[0]              # sum_c_x - sum_c_y
    m = diffs[1]              # h0_x   - h0_y
    d0, d1, d2 = m, -s, s - m
    dist = jnp.sqrt(d0 * d0 + d1 * d1 + d2 * d2) / jnp.float32(batch_size)
    return dist.reshape(1)


def euclidean_ref(x, y, *, batch_size):
    # Pure-JAX reference mirroring the PyTorch module exactly.
    def hist(v):
        t = jnp.tanh(jnp.squeeze(v).astype(jnp.float32))
        c = 1.0 - jnp.cos(0.5 * jnp.pi * t) ** 2
        s = 1.0 - jnp.sin(0.5 * jnp.pi * t) ** 2
        h = jnp.stack([
            jnp.sum(c * (t <= 0)),
            jnp.sum(s),
            jnp.sum(c * (t > 0)),
        ])
        return h[:, None]

    xh = hist(x) / batch_size
    yh = hist(y) / batch_size
    return jnp.sqrt(jnp.sum((xh - yh) ** 2, axis=0))


if __name__ == "__main__":
    batch_size = 2
    n_bin = 3
    key = jax.random.PRNGKey(0)
    kx, ky = jax.random.split(key)
    # NCHW inputs, as in the PyTorch module's expected usage.
    x = jax.random.normal(kx, (batch_size, 4, 16, 16), dtype=jnp.float32)
    y = jax.random.normal(ky, (batch_size, 4, 16, 16), dtype=jnp.float32)

    out = euclidean_pallas(x, y, batch_size=batch_size, n_bin=n_bin)
    out = jax.block_until_ready(out)

    ref = euclidean_ref(x, y, batch_size=batch_size)
    assert out.shape == (1,), out.shape
    assert jnp.allclose(out, ref, rtol=1e-3, atol=1e-3), (out, ref)

    print("KERNEL_OK")
</pallas_src>

<mosaic_0001>
module attributes {stable_mosaic.version = 11 : i64} {
  func.func @kernel(%arg0: i32, %arg1: memref<16x128xf32, #tpu.memory_space<vmem>>, %arg2: memref<16x128xf32, #tpu.memory_space<vmem>>, %arg3: memref<2x8x128xf32, #tpu.memory_space<vmem>>) attributes {dimension_semantics = [#tpu.dimension_semantics<arbitrary>], iteration_bounds = array<i64: 1>, scalar_prefetch = 0 : i64, scratch_operands = 0 : i64, tpu.core_type = #tpu.core_type<tc>, window_params = [{transform_indices = @transform_0, window_bounds = array<i64: 16, 128>}, {transform_indices = @transform_1, window_bounds = array<i64: 16, 128>}, {pipeline_mode = #tpu.pipeline_mode<synchronous>, transform_indices = @transform_2, window_bounds = array<i64: 2, 8, 128>}]} {
    %c0_i32 = arith.constant 0 : i32
    %0 = arith.cmpi eq, %arg0, %c0_i32 : i32
    %1 = arith.extui %0 : i1 to i32
    %c0_i32_0 = arith.constant 0 : i32
    %2 = arith.cmpi ne, %1, %c0_i32_0 : i32
    scf.if %2 {
      %cst_36 = arith.constant 0.000000e+00 : f32
      %79 = vector.broadcast %cst_36 : f32 to vector<2x8x128xf32>
      %c0_37 = arith.constant 0 : index
      %c0_38 = arith.constant 0 : index
      %c0_39 = arith.constant 0 : index
      %80 = vector.load %arg3[%c0_37, %c0_38, %c0_39] : memref<2x8x128xf32, #tpu.memory_space<vmem>>, vector<2x8x128xf32>
      tpu.vector_store %arg3[%c0_37, %c0_38, %c0_39], %79 {strides = array<i32>} : memref<2x8x128xf32, #tpu.memory_space<vmem>>, vector<2x8x128xf32>,
    } else {
    }
    %c0 = arith.constant 0 : index
    %c0_1 = arith.constant 0 : index
    %3 = vector.load %arg1[%c0, %c0_1] : memref<16x128xf32, #tpu.memory_space<vmem>>, vector<16x128xf32>
    %4 = math.tanh %3 : vector<16x128xf32>
    %cst = arith.constant 1.57079637 : f32
    %5 = vector.broadcast %cst : f32 to vector<16x128xf32>
    %6 = arith.mulf %5, %4 : vector<16x128xf32>
    %7 = arith.mulf %6, %6 : vector<16x128xf32>
    %cst_2 = arith.constant -2.50521079E-8 : f32
    %8 = vector.broadcast %cst_2 : f32 to vector<16x128xf32>
    %9 = arith.mulf %8, %7 : vector<16x128xf32>
    %cst_3 = arith.constant 2.75573188E-6 : f32
    %10 = vector.broadcast %cst_3 : f32 to vector<16x128xf32>
    %11 = arith.addf %9, %10 : vector<16x128xf32>
    %12 = arith.mulf %11, %7 : vector<16x128xf32>
    %cst_4 = arith.constant -1.98412701E-4 : f32
    %13 = vector.broadcast %cst_4 : f32 to vector<16x128xf32>
    %14 = arith.addf %12, %13 : vector<16x128xf32>
    %15 = arith.mulf %14, %7 : vector<16x128xf32>
    %cst_5 = arith.constant 0.00833333377 : f32
    %16 = vector.broadcast %cst_5 : f32 to vector<16x128xf32>
    %17 = arith.addf %15, %16 : vector<16x128xf32>
    %18 = arith.mulf %17, %7 : vector<16x128xf32>
    %cst_6 = arith.constant -0.166666672 : f32
    %19 = vector.broadcast %cst_6 : f32 to vector<16x128xf32>
    %20 = arith.addf %18, %19 : vector<16x128xf32>
    %21 = arith.mulf %7, %20 : vector<16x128xf32>
    %cst_7 = arith.constant 1.000000e+00 : f32
    %22 = vector.broadcast %cst_7 : f32 to vector<16x128xf32>
    %23 = arith.addf %22, %21 : vector<16x128xf32>
    %24 = arith.mulf %6, %23 : vector<16x128xf32>
    %25 = arith.mulf %24, %24 : vector<16x128xf32>
    %cst_8 = arith.constant 0.000000e+00 : f32
    %26 = vector.broadcast %cst_8 : f32 to vector<16x128xf32>
    %27 = arith.cmpf ole, %3, %26 : vector<16x128xf32>
    %cst_9 = arith.constant 0.000000e+00 : f32
    %28 = vector.broadcast %cst_9 : f32 to vector<16x128xf32>
    %29 = arith.select %27, %25, %28 : vector<16x128xi1>, vector<16x128xf32>
    %30 = vector.shape_cast %25 : vector<16x128xf32> to vector<2x8x128xf32>
    %cst_10 = arith.constant dense<0.000000e+00> : vector<8x128xf32>
    %31 = vector.multi_reduction <add>, %30, %cst_10 [0] : vector<2x8x128xf32> to vector<8x128xf32>
    %32 = vector.shape_cast %29 : vector<16x128xf32> to vector<2x8x128xf32>
    %cst_11 = arith.constant dense<0.000000e+00> : vector<8x128xf32>
    %33 = vector.multi_reduction <add>, %32, %cst_11 [0] : vector<2x8x128xf32> to vector<8x128xf32>
    %c0_12 = arith.constant 0 : index
    %c0_13 = arith.constant 0 : index
    %34 = vector.load %arg2[%c0_12, %c0_13] : memref<16x128xf32, #tpu.memory_space<vmem>>, vector<16x128xf32>
    %35 = math.tanh %34 : vector<16x128xf32>
    %cst_14 = arith.constant 1.57079637 : f32
    %36 = vector.broadcast %cst_14 : f32 to vector<16x128xf32>
    %37 = arith.mulf %36, %35 : vector<16x128xf32>
    %38 = arith.mulf %37, %37 : vector<16x128xf32>
    %cst_15 = arith.constant -2.50521079E-8 : f32
    %39 = vector.broadcast %cst_15 : f32 to vector<16x128xf32>
    %40 = arith.mulf %39, %38 : vector<16x128xf32>
    %cst_16 = arith.constant 2.75573188E-6 : f32
    %41 = vector.broadcast %cst_16 : f32 to vector<16x128xf32>
    %42 = arith.addf %40, %41 : vector<16x128xf32>
    %43 = arith.mulf %42, %38 : vector<16x128xf32>
    %cst_17 = arith.constant -1.98412701E-4 : f32
    %44 = vector.broadcast %cst_17 : f32 to vector<16x128xf32>
    %45 = arith.addf %43, %44 : vector<16x128xf32>
    %46 = arith.mulf %45, %38 : vector<16x128xf32>
    %cst_18 = arith.constant 0.00833333377 : f32
    %47 = vector.broadcast %cst_18 : f32 to vector<16x128xf32>
    %48 = arith.addf %46, %47 : vector<16x128xf32>
    %49 = arith.mulf %48, %38 : vector<16x128xf32>
    %cst_19 = arith.constant -0.166666672 : f32
    %50 = vector.broadcast %cst_19 : f32 to vector<16x128xf32>
    %51 = arith.addf %49, %50 : vector<16x128xf32>
    %52 = arith.mulf %38, %51 : vector<16x128xf32>
    %cst_20 = arith.constant 1.000000e+00 : f32
    %53 = vector.broadcast %cst_20 : f32 to vector<16x128xf32>
    %54 = arith.addf %53, %52 : vector<16x128xf32>
    %55 = arith.mulf %37, %54 : vector<16x128xf32>
    %56 = arith.mulf %55, %55 : vector<16x128xf32>
    %cst_21 = arith.constant 0.000000e+00 : f32
    %57 = vector.broadcast %cst_21 : f32 to vector<16x128xf32>
    %58 = arith.cmpf ole, %34, %57 : vector<16x128xf32>
    %cst_22 = arith.constant 0.000000e+00 : f32
    %59 = vector.broadcast %cst_22 : f32 to vector<16x128xf32>
    %60 = arith.select %58, %56, %59 : vector<16x128xi1>, vector<16x128xf32>
    %61 = vector.shape_cast %56 : vector<16x128xf32> to vector<2x8x128xf32>
    %cst_23 = arith.constant dense<0.000000e+00> : vector<8x128xf32>
    %62 = vector.multi_reduction <add>, %61, %cst_23 [0] : vector<2x8x128xf32> to vector<8x128xf32>
    %63 = vector.shape_cast %60 : vector<16x128xf32> to vector<2x8x128xf32>
    %cst_24 = arith.constant dense<0.000000e+00> : vector<8x128xf32>
    %64 = vector.multi_reduction <add>, %63, %cst_24 [0] : vector<2x8x128xf32> to vector<8x128xf32>
    %65 = arith.subf %31, %62 : vector<8x128xf32>
    %66 = arith.subf %33, %64 : vector<8x128xf32>
    %c0_25 = arith.constant 0 : index
    %c0_26 = arith.constant 0 : index
    %c0_27 = arith.constant 0 : index
    %67 = vector.load %arg3[%c0_25, %c0_26, %c0_27] : memref<2x8x128xf32, #tpu.memory_space<vmem>>, vector<1x8x128xf32>
    %68 = vector.shape_cast %67 : vector<1x8x128xf32> to vector<8x128xf32>
    %69 = arith.addf %68, %65 : vector<8x128xf32>
    %c0_28 = arith.constant 0 : index
    %c0_29 = arith.constant 0 : index
    %c0_30 = arith.constant 0 : index
    %70 = vector.load %arg3[%c0_28, %c0_29, %c0_30] : memref<2x8x128xf32, #tpu.memory_space<vmem>>, vector<1x8x128xf32>
    %71 = vector.shape_cast %70 : vector<1x8x128xf32> to vector<8x128xf32>
    %72 = vector.shape_cast %69 : vector<8x128xf32> to vector<1x8x128xf32>
    tpu.vector_store %arg3[%c0_28, %c0_29, %c0_30], %72 {strides = array<i32>} : memref<2x8x128xf32, #tpu.memory_space<vmem>>, vector<1x8x128xf32>,
    %c1 = arith.constant 1 : index
    %c0_31 = arith.constant 0 : index
    %c0_32 = arith.constant 0 : index
    %73 = vector.load %arg3[%c1, %c0_31, %c0_32] : memref<2x8x128xf32, #tpu.memory_space<vmem>>, vector<1x8x128xf32>
    %74 = vector.shape_cast %73 : vector<1x8x128xf32> to vector<8x128xf32>
    %75 = arith.addf %74, %66 : vector<8x128xf32>
    %c1_33 = arith.constant 1 : index
    %c0_34 = arith.constant 0 : index
    %c0_35 = arith.constant 0 : index
    %76 = vector.load %arg3[%c1_33, %c0_34, %c0_35] : memref<2x8x128xf32, #tpu.memory_space<vmem>>, vector<1x8x128xf32>
    %77 = vector.shape_cast %76 : vector<1x8x128xf32> to vector<8x128xf32>
    %78 = vector.shape_cast %75 : vector<8x128xf32> to vector<1x8x128xf32>
    tpu.vector_store %arg3[%c1_33, %c0_34, %c0_35], %78 {strides = array<i32>} : memref<2x8x128xf32, #tpu.memory_space<vmem>>, vector<1x8x128xf32>,
    return
  }
  func.func @transform_0(%arg0: i32) -> (i32, i32) {
    %c0_i32 = arith.constant 0 : i32
    %c0_i32_0 = arith.constant 0 : i32
    return %arg0, %c0_i32 : i32, i32
  }
  func.func @transform_1(%arg0: i32) -> (i32, i32) {
    %c0_i32 = arith.constant 0 : i32
    %c0_i32_0 = arith.constant 0 : i32
    return %arg0, %c0_i32 : i32, i32
  }
  func.func @transform_2(%arg0: i32) -> (i32, i32, i32) {
    %c0_i32 = arith.constant 0 : i32
    %c0_i32_0 = arith.constant 0 : i32
    %c0_i32_1 = arith.constant 0 : i32
    %c0_i32_2 = arith.constant 0 : i32
    return %c0_i32, %c0_i32_0, %c0_i32_1 : i32, i32, i32
  }
}

</mosaic_0001>

<bundles_post_ra>
// kernel: tpu_custom_call.1
= control target key start
LH: loop header
LB: loop body
LE: loop exit
PB: predicated region body
PF: predicated region fallthrough
CT: control target
= control target key end

     0   :  { %7 = vsyncpa [#allocation3], 0  ;;  %s283_s0 = inlined_call_operand.hbm [shape: f32[16,128], index: 0, kind: input, shape index: {}]   ;;  %s284_s1 = inlined_call_operand.hbm [shape: f32[16,128], index: 1, kind: input, shape index: {}]   ;;  %s285_s2 = inlined_call_operand.hbm [shape: f32[2,8,128], index: 2, kind: output, shape index: {}]  }
   0x1   :  { %8 = vsyncpa [#allocation6], 0 }
   0x2   :  { %9 = vsyncpa [#allocation4], 0  ;;  %s229_s9 = smov [#allocation2]  }
   0x3   :  { %s15_s10 = sshll.u32 %s229_s9, 4  ;;  %s16_s10 = int_to_ptr.vmem [resolvable:$true] %s15_s10 }
   0x4   :  { %s171_s11 = scalar_lea.vmem %s16_s10, 256  ;;  %p176_p1 = scmp.lt.s32.totalorder %s16_s10, %s16_s10 }
   0x5   :  { %p172_p0 = scmp.ne.s32.totalorder %s16_s10, %s171_s11  ;;  %p177_p2 = scmp.lt.s32.totalorder %s171_s11, %s171_s11 }
   0x7   :  { %p178_p3 = por %p177_p2, %p176_p1 }
   0x9   :  { %p179_p4 = pnand %p178_p3, %p172_p0 }
   0xb   :  { %182 = shalt.err (!%p179_p4)
}
   0xc   :  { %s230_s12 = smov 128   ;;  %s231_s13 = smov 8  }
   0xd   :  { %21 = dma.hbm_to_vmem [thread:$0]  %s283_s0, 256, %s16_s10, [#allocation3], %s230_s12, %s230_s12, %s231_s13  }
   0xe   :  { %s232_s16 = smov [#allocation5]  }
   0xf   :  { %s27_s17 = sshll.u32 %s232_s16, 4  ;;  %s28_s17 = int_to_ptr.vmem [resolvable:$true] %s27_s17 }
  0x10   :  { %s191_s18 = scalar_lea.vmem %s28_s17, 256  ;;  %p196_p6 = scmp.lt.s32.totalorder %s28_s17, %s28_s17 }
  0x11   :  { %p192_p5 = scmp.ne.s32.totalorder %s28_s17, %s191_s18  ;;  %p197_p7 = scmp.lt.s32.totalorder %s191_s18, %s191_s18 }
  0x13   :  { %p198_p8 = por %p197_p7, %p196_p6 }
  0x15   :  { %p199_p9 = pnand %p198_p8, %p192_p5 }
  0x17   :  { %202 = shalt.err (!%p199_p9)
}
  0x18   :  { %33 = dma.hbm_to_vmem [thread:$0]  %s284_s1, 256, %s28_s17, [#allocation6], %s230_s12, %s230_s12, %s231_s13  }
  0x19   :  { %223 = dma.done.wait [#allocation3], 256  }
  0x1a   :  { %224 = vsyncadd [#allocation3], 4294967040 }
  0x1b   :  { %225 = dma.done.wait [#allocation6], 256  }
  0x1c   :  { %226 = vsyncadd [#allocation6], 4294967040  ;;  %v261_v0 = vld [vmem:[#allocation2] sm:$0xff]  ;;  %v263_v1 = vld [vmem:[#allocation2 + $0x8] sm:$0xff]  ;;  %s233_s0 = smov [#allocation7]  }
  0x1d   :  { %v265_v2 = vld [vmem:[#allocation5] sm:$0xff]  ;;  %155 = vtanh.f32 %v261_v0  ;;  %v268_v3 = vld [vmem:[#allocation5 + $0x8] sm:$0xff]  ;;  %vm78_vm0 = vcmp.le.f32.partialorder %v261_v0, 0.0  ;;  %vm79_vm1 = vcmp.le.f32.partialorder %v263_v1, 0.0  ;;  %s136_s1 = sshll.u32 %s233_s0, 4  ;;  %s137_s1 = int_to_ptr.vmem [resolvable:$true] %s136_s1 }
  0x1e   :  { %157 = vtanh.f32 %v263_v1  ;;  %vm116_vm2 = vcmp.le.f32.partialorder %v265_v2, 0.0  ;;  %vm117_vm3 = vcmp.le.f32.partialorder %v268_v3, 0.0  ;;  %s203_s21 = scalar_lea.vmem %s137_s1, 256  ;;  %p208_p11 = scmp.lt.s32.totalorder %s137_s1, %s137_s1 }
  0x1f   :  { %159 = vtanh.f32 %v265_v2  ;;  %p204_p10 = scmp.ne.s32.totalorder %s137_s1, %s203_s21  ;;  %p209_p12 = scmp.lt.s32.totalorder %s203_s21, %s203_s21 }
  0x20   :  { %161 = vtanh.f32 %v268_v3 }
  0x21   :  { %p210_p13 = por %p209_p12, %p208_p11 }
  0x23   :  { %p211_p0 = pnand %p210_p13, %p204_p10 }
  0x2a   :  { %v156_v4 = vpop.eup %155 }
  0x2b   :  { %v158_v5 = vpop.eup %157  ;;  %v50_v6 = vmul.f32 1.5707964, %v156_v4 }
  0x2c   :  { %v160_v7 = vpop.eup %159  ;;  %v51_v8 = vmul.f32 1.5707964, %v158_v5 }
  0x2d   :  { %v162_v9 = vpop.eup %161  ;;  %v52_v10 = vmul.f32 %v50_v6, %v50_v6  ;;  %v88_v11 = vmul.f32 1.5707964, %v160_v7 }
  0x2e   :  { %v53_v12 = vmul.f32 %v51_v8, %v51_v8  ;;  %v89_v13 = vmul.f32 1.5707964, %v162_v9 }
  0x2f   :  { %v54_v14 = vmul.f32 -2.5052108e-08, %v52_v10  ;;  %v90_v15 = vmul.f32 %v88_v11, %v88_v11 }
  0x30   :  { %v55_v16 = vmul.f32 -2.5052108e-08, %v53_v12  ;;  %v91_v17 = vmul.f32 %v89_v13, %v89_v13 }
  0x31   :  { %v56_v18 = vadd.f32 2.7557319e-06, %v54_v14  ;;  %v92_v19 = vmul.f32 -2.5052108e-08, %v90_v15 }
  0x32   :  { %v57_v20 = vadd.f32 2.7557319e-06, %v55_v16  ;;  %v93_v21 = vmul.f32 -2.5052108e-08, %v91_v17 }
  0x33   :  { %v58_v22 = vmul.f32 %v56_v18, %v52_v10  ;;  %v94_v23 = vadd.f32 2.7557319e-06, %v92_v19 }
  0x34   :  { %v59_v24 = vmul.f32 %v57_v20, %v53_v12  ;;  %v95_v25 = vadd.f32 2.7557319e-06, %v93_v21 }
  0x35   :  { %v60_v26 = vadd.f32 -0.0001984127, %v58_v22  ;;  %v96_v27 = vmul.f32 %v94_v23, %v90_v15 }
  0x36   :  { %v61_v28 = vadd.f32 -0.0001984127, %v59_v24  ;;  %v97_v29 = vmul.f32 %v95_v25, %v91_v17 }
  0x37   :  { %v62_v30 = vmul.f32 %v60_v26, %v52_v10  ;;  %v98_v31 = vadd.f32 -0.0001984127, %v96_v27 }
  0x38   :  { %v63_v32 = vmul.f32 %v61_v28, %v53_v12  ;;  %v99_v33 = vadd.f32 -0.0001984127, %v97_v29 }
  0x39   :  { %v64_v34 = vadd.f32 0.008333334, %v62_v30  ;;  %v100_v35 = vmul.f32 %v98_v31, %v90_v15 }
  0x3a   :  { %v65_v36 = vadd.f32 0.008333334, %v63_v32  ;;  %v101_v37 = vmul.f32 %v99_v33, %v91_v17 }
  0x3b   :  { %v66_v38 = vmul.f32 %v64_v34, %v52_v10  ;;  %v102_v39 = vadd.f32 0.008333334, %v100_v35 }
  0x3c   :  { %v67_v40 = vmul.f32 %v65_v36, %v53_v12  ;;  %v103_v41 = vadd.f32 0.008333334, %v101_v37 }
  0x3d   :  { %v68_v42 = vadd.f32 -0.16666667, %v66_v38  ;;  %v104_v43 = vmul.f32 %v102_v39, %v90_v15 }
  0x3e   :  { %v69_v44 = vadd.f32 -0.16666667, %v67_v40  ;;  %v105_v45 = vmul.f32 %v103_v41, %v91_v17 }
  0x3f   :  { %v70_v46 = vmul.f32 %v68_v42, %v52_v10  ;;  %v106_v47 = vadd.f32 -0.16666667, %v104_v43 }
  0x40   :  { %v71_v48 = vmul.f32 %v69_v44, %v53_v12  ;;  %v107_v49 = vadd.f32 -0.16666667, %v105_v45 }
  0x41   :  { %v72_v50 = vadd.f32 1.0, %v70_v46  ;;  %v108_v51 = vmul.f32 %v106_v47, %v90_v15 }
  0x42   :  { %v73_v52 = vadd.f32 1.0, %v71_v48  ;;  %v109_v53 = vmul.f32 %v107_v49, %v91_v17 }
  0x43   :  { %v74_v54 = vmul.f32 %v72_v50, %v50_v6  ;;  %v110_v55 = vadd.f32 1.0, %v108_v51 }
  0x44   :  { %v75_v56 = vmul.f32 %v73_v52, %v51_v8  ;;  %v111_v57 = vadd.f32 1.0, %v109_v53 }
  0x45   :  { %v76_v58 = vmul.f32 %v74_v54, %v74_v54  ;;  %v112_v59 = vmul.f32 %v110_v55, %v88_v11 }
  0x46   :  { %v77_v60 = vmul.f32 %v75_v56, %v75_v56  ;;  %v113_v61 = vmul.f32 %v111_v57, %v89_v13 }
  0x47   :  { %v114_v62 = vmul.f32 %v112_v59, %v112_v59  ;;  %v80_v63 = vsel %vm78_vm0, %v76_v58, 0.0 }
  0x48   :  { %v82_v4 = vadd.f32 %v77_v60, %v76_v58  ;;  %v115_v5 = vmul.f32 %v113_v61, %v113_v61  ;;  %v81_v6 = vsel %vm79_vm1, %v77_v60, 0.0 }
  0x49   :  { %v83_v7 = vadd.f32 %v81_v6, %v80_v63  ;;  %v118_v8 = vsel %vm116_vm2, %v114_v62, 0.0 }
  0x4a   :  { %v120_v9 = vadd.f32 %v115_v5, %v114_v62  ;;  %v119_v10 = vsel %vm117_vm3, %v115_v5, 0.0 }
  0x4b   :  { %v121_v0 = vadd.f32 %v119_v10, %v118_v8 }
  0x4c   :  { %v122_v12 = vsub.f32 %v82_v4, %v120_v9 }
  0x4d   :  { %v123_v1 = vsub.f32 %v83_v7, %v121_v0 }
  0x4e   :  { %126 = vst [vmem:[#allocation7] sm:$0xff] %v122_v12 }
  0x4f   :  { %130 = vst [vmem:[#allocation7 + $0x8] sm:$0xff] %v123_v1 }
  0x50   :  { %214 = shalt.err (!%p211_p0)
}
  0x51   :  { %142 = dma.vmem_to_hbm [thread:$0]  %s137_s1, 256, %s285_s2, [#allocation4], %s230_s12, %s230_s12, %s231_s13  }
  0x52   :  { %227 = dma.done.wait [#allocation4], 256  }
  0x53   :  { %228 = vsyncadd [#allocation4], 4294967040 }
  0x54   :  { %146 = vsyncpa [#allocation3], 1 }
  0x55   :  { %147 = vsyncpa [#allocation6], 1 }
  0x56   :  { %148 = vsyncpa [#allocation4], 1 }

</bundles_post_ra>
